<compile_context>
chip_gen: v7x
topology: tpu7x:2x2x1
jax: 0.10.0
libtpu: 0.0.40
codegen_flags: <defaults>
</compile_context>

<pallas_src>
import math
import functools

import jax
import jax.numpy as jnp
from jax.experimental import pallas as pl
from jax.experimental.pallas import tpu as pltpu


def _self_attn_kernel(*refs, num_heads, head_dim, seq_len, block_batch, eps,
                      has_pos, compute_dtype):
    """One grid step processes Bt batch elements x the full sequence.

    Ref shapes:
      tgt_ref / pos_ref : (L, Bt*E)  lane-dense activation tiles
      wqk_ref           : (E, 2E)    pre-transposed [Wq*scale ; Wk]   (compute dtype)
      wv_ref, wo_ref    : (E, E)     pre-transposed Wv / Wo           (compute dtype)
      bqk_ref           : (1, 2E)    [bq*scale, bk]                   (f32)
      vec_ref           : (4, E)     [b_v, b_o, ln_gamma, ln_beta]    (f32)
      out_ref           : (L, Bt*E)
    """
    if has_pos:
        tgt_ref, pos_ref, wqk_ref, wv_ref, wo_ref, bqk_ref, vec_ref, out_ref = refs
    else:
        tgt_ref, wqk_ref, wv_ref, wo_ref, bqk_ref, vec_ref, out_ref = refs

    H, hd, L, Bt = num_heads, head_dim, seq_len, block_batch
    E = H * hd
    R = Bt * L                                   # rows per step, ordered (b, l)
    approx = jnp.dtype(compute_dtype) != jnp.dtype(jnp.float32)

    def to_rows(ref):
        # (L, Bt*E) -> (L, Bt, E) -> (Bt, L, E) -> (Bt*L, E); all tile-friendly.
        x3 = ref[...].astype(jnp.float32).reshape(L, Bt, E)
        return jnp.swapaxes(x3, 0, 1).reshape(R, E)

    x = to_rows(tgt_ref)                         # value / residual input
    if has_pos:
        qk_in = x + to_rows(pos_ref)             # with_pos_embed
    else:
        qk_in = x

    vecs = vec_ref[...]                          # (4, E) f32

    # Fused Q/K projection (Q scale folded into the weight) and V projection.
    qk = jnp.dot(qk_in.astype(compute_dtype), wqk_ref[...],
                 preferred_element_type=jnp.float32) + bqk_ref[...]        # (R, 2E)
    v = jnp.dot(x.astype(compute_dtype), wv_ref[...],
                preferred_element_type=jnp.float32) + vecs[0:1]            # (R, E)

    q = qk[:, :E].astype(compute_dtype)
    k = qk[:, E:].astype(compute_dtype)
    vc = v.astype(compute_dtype)

    # Per-head attention: heads are sliced off the lane axis (hd << 128) and the
    # small static loop keeps every reshape a simple leading-dim split/merge.
    ctx_parts = []
    for h in range(H):
        sl = slice(h * hd, (h + 1) * hd)
        qh = q[:, sl].reshape(Bt, L, hd)
        kh = k[:, sl].reshape(Bt, L, hd)
        vh = vc[:, sl].reshape(Bt, L, hd)
        s = jnp.einsum('bld,bmd->blm', qh, kh,
                       preferred_element_type=jnp.float32)                 # (Bt, L, L)
        s = s - jnp.max(s, axis=-1, keepdims=True)
        p = jnp.exp(s)
        p = p * pl.reciprocal(jnp.sum(p, axis=-1, keepdims=True), approx=approx)
        ch = jnp.einsum('blm,bmd->bld', p.astype(compute_dtype), vh,
                        preferred_element_type=jnp.float32)                # (Bt, L, hd)
        ctx_parts.append(ch.reshape(R, hd))
    ctx = jnp.concatenate(ctx_parts, axis=-1)                              # (R, E)

    attn = jnp.dot(ctx.astype(compute_dtype), wo_ref[...],
                   preferred_element_type=jnp.float32) + vecs[1:2]         # (R, E)

    # residual (dropout p=0.0 == identity) + LayerNorm over E, in f32
    y = x + attn
    mean = jnp.mean(y, axis=-1, keepdims=True)
    yc = y - mean
    var = jnp.mean(yc * yc, axis=-1, keepdims=True)
    out = yc * jax.lax.rsqrt(var + eps) * vecs[2:3] + vecs[3:4]            # (R, E)

    # rows (b, l) -> lane-dense (L, Bt*E) tile for the store
    out3 = jnp.swapaxes(out.reshape(Bt, L, E), 0, 1).reshape(L, Bt * E)
    out_ref[...] = out3.astype(out_ref.dtype)


def _choose_block_batch(N, L, E):
    """Batch elements per grid step: target ~128 MXU rows (Bt*L), Bt divides N,
    and the (L, Bt*E) tile stays legal (lane width multiple of 128 or full width).
    On v7x prefer an even grid length (2 TensorCores); at demo sizes N is tiny."""
    target = max(1, 128 // max(L, 1))
    for bt in range(min(N, target), 0, -1):
        if N % bt == 0 and (bt == N or (bt * E) % 128 == 0):
            return bt
    return N  # whole batch in one step: always a legal full-width block


def self_attention_layer(tgt, query_pos, params, *, num_heads, eps=1e-5,
                         compute_dtype=jnp.bfloat16, block_batch=None):
    """tgt, query_pos: (L, N, E) float32 (PyTorch MHA layout). Returns (L, N, E).

    compute_dtype: dtype of the MXU matmul inputs (accumulation is always f32);
    bf16 is the v6e/v7x fast path, float32 matches the reference to ~1e-5.
    """
    # TODO(synk): attn_mask / key_padding_mask are not implemented (the reference
    # forward passes None for both); dropout p=0.0 is the identity.
    L, N, E = tgt.shape
    head_dim = E // num_heads
    assert head_dim * num_heads == E

    Bt = block_batch if block_batch is not None else _choose_block_batch(N, L, E)
    assert N % Bt == 0
    num_blocks = N // Bt

    # Lane-dense 2-D views: free reshapes of contiguous (L, N, E) arrays — no HBM
    # transposes on either side of the kernel.
    seq_spec = pl.BlockSpec((L, Bt * E), lambda b: (0, b))
    args = [tgt.reshape(L, N * E)]
    in_specs = [seq_spec]
    has_pos = query_pos is not None
    if has_pos:
        args.append(query_pos.reshape(L, N * E))
        in_specs.append(seq_spec)

    # Weights: split packed in_proj, pre-transpose once, fold the Q scale, fuse Q/K.
    scale = 1.0 / math.sqrt(head_dim)
    w_in = params['in_proj_weight']                          # (3E, E)
    wq, wk, wv = w_in[:E], w_in[E:2 * E], w_in[2 * E:]
    wqk_t = jnp.concatenate([wq * scale, wk], axis=0).T.astype(compute_dtype)  # (E, 2E)
    wv_t = wv.T.astype(compute_dtype)                                           # (E, E)
    wo_t = params['out_proj_weight'].T.astype(compute_dtype)                    # (E, E)

    b_in = params['in_proj_bias']
    bqk = jnp.concatenate([b_in[:E] * scale, b_in[E:2 * E]]
                          ).reshape(1, 2 * E).astype(jnp.float32)                # (1, 2E)
    vec4 = jnp.stack([b_in[2 * E:], params['out_proj_bias'],
                      params['ln_weight'], params['ln_bias']],
                     axis=0).astype(jnp.float32)                                 # (4, E)

    args += [wqk_t, wv_t, wo_t, bqk, vec4]
    const = lambda b: (0, 0)
    in_specs += [pl.BlockSpec((E, 2 * E), const),
                 pl.BlockSpec((E, E), const),
                 pl.BlockSpec((E, E), const),
                 pl.BlockSpec((1, 2 * E), const),
                 pl.BlockSpec((4, E), const)]

    kernel = functools.partial(_self_attn_kernel,
                               num_heads=num_heads, head_dim=head_dim,
                               seq_len=L, block_batch=Bt, eps=eps,
                               has_pos=has_pos, compute_dtype=compute_dtype)

    out2d = pl.pallas_call(
        kernel,
        out_shape=jax.ShapeDtypeStruct((L, N * E), tgt.dtype),
        grid=(num_blocks,),
        in_specs=in_specs,
        out_specs=pl.BlockSpec((L, Bt * E), lambda b: (0, b)),
        compiler_params=pltpu.CompilerParams(
            dimension_semantics=("parallel",)),
    )(*args)

    return out2d.reshape(L, N, E)


def _reference(tgt, query_pos, params, *, num_heads, eps=1e-5):
    """Pure-JAX reference mirroring PyTorch nn.MultiheadAttention + LayerNorm."""
    L, N, E = tgt.shape
    hd = E // num_heads
    qk_in = tgt + query_pos
    wq, wk, wv = (params['in_proj_weight'][i * E:(i + 1) * E] for i in range(3))
    bq, bk, bv = (params['in_proj_bias'][i * E:(i + 1) * E] for i in range(3))
    q = qk_in @ wq.T + bq
    k = qk_in @ wk.T + bk
    v = tgt @ wv.T + bv

    def to_heads(x):
        return x.reshape(L, N, num_heads, hd).transpose(1, 2, 0, 3)

    qh, kh, vh = to_heads(q) / math.sqrt(hd), to_heads(k), to_heads(v)
    s = jnp.einsum('nhld,nhmd->nhlm', qh, kh)
    p = jax.nn.softmax(s, axis=-1)
    ctx = jnp.einsum('nhlm,nhmd->nhld', p, vh)
    ctx = ctx.transpose(2, 0, 1, 3).reshape(L, N, E)
    attn = ctx @ params['out_proj_weight'].T + params['out_proj_bias']
    y = tgt + attn
    mean = y.mean(-1, keepdims=True)
    var = ((y - mean) ** 2).mean(-1, keepdims=True)
    return (y - mean) / jnp.sqrt(var + eps) * params['ln_weight'] + params['ln_bias']


def init_params(key, model_dims):
    """xavier_uniform on dim>1 params (as in _reset_parameters), zeros/ones elsewhere."""
    E = model_dims
    k1, k2 = jax.random.split(key)
    bnd_in = math.sqrt(6.0 / (3 * E + E))
    bnd_out = math.sqrt(6.0 / (E + E))
    return {
        'in_proj_weight': jax.random.uniform(k1, (3 * E, E), jnp.float32, -bnd_in, bnd_in),
        'in_proj_bias': jnp.zeros((3 * E,), jnp.float32),
        'out_proj_weight': jax.random.uniform(k2, (E, E), jnp.float32, -bnd_out, bnd_out),
        'out_proj_bias': jnp.zeros((E,), jnp.float32),
        'ln_weight': jnp.ones((E,), jnp.float32),
        'ln_bias': jnp.zeros((E,), jnp.float32),
    }


if __name__ == "__main__":
    L, N, E, H = 8, 2, 32, 4   # seq, batch, model_dims, num_heads
    key = jax.random.PRNGKey(0)
    kp, kt, kq, kb1, kb2, kg, kb3 = jax.random.split(key, 7)

    params = init_params(kp, E)
    # small non-zero biases / affine LN params so those code paths are exercised
    params['in_proj_bias'] = 0.1 * jax.random.normal(kb1, (3 * E,), jnp.float32)
    params['out_proj_bias'] = 0.1 * jax.random.normal(kb2, (E,), jnp.float32)
    params['ln_weight'] = 1.0 + 0.1 * jax.random.normal(kg, (E,), jnp.float32)
    params['ln_bias'] = 0.1 * jax.random.normal(kb3, (E,), jnp.float32)

    tgt = jax.random.normal(kt, (L, N, E), jnp.float32)
    query_pos = jax.random.normal(kq, (L, N, E), jnp.float32)

    ref = _reference(tgt, query_pos, params, num_heads=H)

    # exact path (f32 matmul inputs) -- tight tolerance
    out_f32 = jax.block_until_ready(
        self_attention_layer(tgt, query_pos, params, num_heads=H,
                             compute_dtype=jnp.float32))
    assert out_f32.shape == (L, N, E)
    assert jnp.allclose(out_f32, ref, atol=1e-4, rtol=1e-4), "f32 kernel mismatch"

    # bf16-MXU fast path (v6e/v7x) -- bf16 inputs, f32 accumulation
    out_bf16 = jax.block_until_ready(
        self_attention_layer(tgt, query_pos, params, num_heads=H,
                             compute_dtype=jnp.bfloat16))
    assert jnp.allclose(out_bf16, ref, atol=5e-2, rtol=5e-2), "bf16 kernel mismatch"

    # query_pos=None fast path (no zero stream materialized / DMA'd)
    out_np = jax.block_until_ready(
        self_attention_layer(tgt, None, params, num_heads=H,
                             compute_dtype=jnp.float32))
    ref_np = _reference(tgt, jnp.zeros_like(tgt), params, num_heads=H)
    assert jnp.allclose(out_np, ref_np, atol=1e-4, rtol=1e-4), "no-pos kernel mismatch"

    print("KERNEL_OK")
</pallas_src>

<mosaic_0001>
module attributes {stable_mosaic.version = 11 : i64} {
  func.func @_self_attn_kernel(%arg0: i32, %arg1: memref<8x64xf32, #tpu.memory_space<vmem>>, %arg2: memref<8x64xf32, #tpu.memory_space<vmem>>, %arg3: memref<32x64xf32, #tpu.memory_space<vmem>>, %arg4: memref<32x32xf32, #tpu.memory_space<vmem>>, %arg5: memref<32x32xf32, #tpu.memory_space<vmem>>, %arg6: memref<1x64xf32, #tpu.memory_space<vmem>>, %arg7: memref<4x32xf32, #tpu.memory_space<vmem>>, %arg8: memref<8x64xf32, #tpu.memory_space<vmem>>) attributes {dimension_semantics = [#tpu.dimension_semantics<parallel>], iteration_bounds = array<i64: 1>, scalar_prefetch = 0 : i64, scratch_operands = 0 : i64, tpu.core_type = #tpu.core_type<tc>, window_params = [{transform_indices = @transform_0, window_bounds = array<i64: 8, 64>}, {transform_indices = @transform_1, window_bounds = array<i64: 8, 64>}, {pipeline_mode = #tpu.pipeline_mode<synchronous>, transform_indices = @transform_2, window_bounds = array<i64: 32, 64>}, {pipeline_mode = #tpu.pipeline_mode<synchronous>, transform_indices = @transform_3, window_bounds = array<i64: 32, 32>}, {pipeline_mode = #tpu.pipeline_mode<synchronous>, transform_indices = @transform_4, window_bounds = array<i64: 32, 32>}, {pipeline_mode = #tpu.pipeline_mode<synchronous>, transform_indices = @transform_5, window_bounds = array<i64: 1, 64>}, {pipeline_mode = #tpu.pipeline_mode<synchronous>, transform_indices = @transform_6, window_bounds = array<i64: 4, 32>}, {transform_indices = @transform_7, window_bounds = array<i64: 8, 64>}]} {
    %c0 = arith.constant 0 : index
    %c0_0 = arith.constant 0 : index
    %0 = vector.load %arg1[%c0, %c0_0] : memref<8x64xf32, #tpu.memory_space<vmem>>, vector<8x64xf32>
    %1 = vector.shape_cast %0 : vector<8x64xf32> to vector<8x2x32xf32>
    %2 = tpu.transpose %1, [1, 0, 2] : vector<8x2x32xf32> -> vector<2x8x32xf32>
    %3 = vector.shape_cast %2 : vector<2x8x32xf32> to vector<16x32xf32>
    %c0_1 = arith.constant 0 : index
    %c0_2 = arith.constant 0 : index
    %4 = vector.load %arg2[%c0_1, %c0_2] : memref<8x64xf32, #tpu.memory_space<vmem>>, vector<8x64xf32>
    %5 = vector.shape_cast %4 : vector<8x64xf32> to vector<8x2x32xf32>
    %6 = tpu.transpose %5, [1, 0, 2] : vector<8x2x32xf32> -> vector<2x8x32xf32>
    %7 = vector.shape_cast %6 : vector<2x8x32xf32> to vector<16x32xf32>
    %8 = arith.addf %3, %7 : vector<16x32xf32>
    %c0_3 = arith.constant 0 : index
    %c0_4 = arith.constant 0 : index
    %9 = vector.load %arg7[%c0_3, %c0_4] : memref<4x32xf32, #tpu.memory_space<vmem>>, vector<4x32xf32>
    %c0_5 = arith.constant 0 : index
    %c0_6 = arith.constant 0 : index
    %10 = vector.load %arg3[%c0_5, %c0_6] : memref<32x64xf32, #tpu.memory_space<vmem>>, vector<32x64xf32>
    %cst = arith.constant dense<0.000000e+00> : vector<16x64xf32>
    %11 = tpu.matmul %8, %10, %cst {dimension_numbers = #tpu.dot_dimension_numbers<[1], [0], [0], [1], [0, 0, 1, 1], [], []>} : vector<16x32xf32>, vector<32x64xf32>, vector<16x64xf32> -> vector<16x64xf32>
    %c0_7 = arith.constant 0 : index
    %c0_8 = arith.constant 0 : index
    %12 = vector.load %arg6[%c0_7, %c0_8] : memref<1x64xf32, #tpu.memory_space<vmem>>, vector<1x64xf32>
    %13 = vector.broadcast %12 : vector<1x64xf32> to vector<16x64xf32>
    %14 = arith.addf %11, %13 : vector<16x64xf32>
    %c0_9 = arith.constant 0 : index
    %c0_10 = arith.constant 0 : index
    %15 = vector.load %arg4[%c0_9, %c0_10] : memref<32x32xf32, #tpu.memory_space<vmem>>, vector<32x32xf32>
    %cst_11 = arith.constant dense<0.000000e+00> : vector<16x32xf32>
    %16 = tpu.matmul %3, %15, %cst_11 {dimension_numbers = #tpu.dot_dimension_numbers<[1], [0], [0], [1], [0, 0, 1, 1], [], []>} : vector<16x32xf32>, vector<32x32xf32>, vector<16x32xf32> -> vector<16x32xf32>
    %17 = vector.extract_strided_slice %9 {offsets = [0, 0], sizes = [1, 32], strides = [1, 1]} : vector<4x32xf32> to vector<1x32xf32>
    %18 = vector.broadcast %17 : vector<1x32xf32> to vector<16x32xf32>
    %19 = arith.addf %16, %18 : vector<16x32xf32>
    %20 = vector.extract_strided_slice %14 {offsets = [0, 0], sizes = [16, 32], strides = [1, 1]} : vector<16x64xf32> to vector<16x32xf32>
    %21 = vector.extract_strided_slice %14 {offsets = [0, 32], sizes = [16, 32], strides = [1, 1]} : vector<16x64xf32> to vector<16x32xf32>
    %22 = vector.extract_strided_slice %20 {offsets = [0, 0], sizes = [16, 8], strides = [1, 1]} : vector<16x32xf32> to vector<16x8xf32>
    %23 = vector.shape_cast %22 : vector<16x8xf32> to vector<2x8x8xf32>
    %24 = vector.extract_strided_slice %21 {offsets = [0, 0], sizes = [16, 8], strides = [1, 1]} : vector<16x32xf32> to vector<16x8xf32>
    %25 = vector.shape_cast %24 : vector<16x8xf32> to vector<2x8x8xf32>
    %26 = vector.extract_strided_slice %19 {offsets = [0, 0], sizes = [16, 8], strides = [1, 1]} : vector<16x32xf32> to vector<16x8xf32>
    %27 = vector.shape_cast %26 : vector<16x8xf32> to vector<2x8x8xf32>
    "tpu.trace_start"() <{level = 10 : i32, message = "bld,bmd->blm"}> : () -> ()
    %cst_12 = arith.constant dense<0.000000e+00> : vector<2x8x8xf32>
    %28 = tpu.matmul %23, %25, %cst_12 {dimension_numbers = #tpu.dot_dimension_numbers<[2], [2], [1], [1], [0, 0, 0, 1, 1, 1], [0], [0]>} : vector<2x8x8xf32>, vector<2x8x8xf32>, vector<2x8x8xf32> -> vector<2x8x8xf32>
    "tpu.trace_stop"() : () -> ()
    %cst_13 = arith.constant dense<0xFF800000> : vector<2x8xf32>
    %29 = vector.multi_reduction <maximumf>, %28, %cst_13 [2] : vector<2x8x8xf32> to vector<2x8xf32>
    %30 = vector.shape_cast %29 : vector<2x8xf32> to vector<2x8x1xf32>
    %31 = vector.broadcast %30 : vector<2x8x1xf32> to vector<2x8x8xf32>
    %32 = arith.subf %28, %31 : vector<2x8x8xf32>
    %33 = math.exp %32 : vector<2x8x8xf32>
    %cst_14 = arith.constant dense<0.000000e+00> : vector<2x8xf32>
    %34 = vector.multi_reduction <add>, %33, %cst_14 [2] : vector<2x8x8xf32> to vector<2x8xf32>
    %35 = vector.shape_cast %34 : vector<2x8xf32> to vector<2x8x1xf32>
    %36 = tpu.reciprocal %35 : vector<2x8x1xf32> -> vector<2x8x1xf32>
    %37 = vector.broadcast %36 : vector<2x8x1xf32> to vector<2x8x8xf32>
    %38 = arith.mulf %33, %37 : vector<2x8x8xf32>
    "tpu.trace_start"() <{level = 10 : i32, message = "blm,bmd->bld"}> : () -> ()
    %cst_15 = arith.constant dense<0.000000e+00> : vector<2x8x8xf32>
    %39 = tpu.matmul %38, %27, %cst_15 {dimension_numbers = #tpu.dot_dimension_numbers<[2], [1], [1], [2], [0, 0, 0, 1, 1, 2], [0], [0]>} : vector<2x8x8xf32>, vector<2x8x8xf32>, vector<2x8x8xf32> -> vector<2x8x8xf32>
    "tpu.trace_stop"() : () -> ()
    %40 = vector.shape_cast %39 : vector<2x8x8xf32> to vector<16x8xf32>
    %41 = vector.extract_strided_slice %20 {offsets = [0, 8], sizes = [16, 8], strides = [1, 1]} : vector<16x32xf32> to vector<16x8xf32>
    %42 = vector.shape_cast %41 : vector<16x8xf32> to vector<2x8x8xf32>
    %43 = vector.extract_strided_slice %21 {offsets = [0, 8], sizes = [16, 8], strides = [1, 1]} : vector<16x32xf32> to vector<16x8xf32>
    %44 = vector.shape_cast %43 : vector<16x8xf32> to vector<2x8x8xf32>
    %45 = vector.extract_strided_slice %19 {offsets = [0, 8], sizes = [16, 8], strides = [1, 1]} : vector<16x32xf32> to vector<16x8xf32>
    %46 = vector.shape_cast %45 : vector<16x8xf32> to vector<2x8x8xf32>
    "tpu.trace_start"() <{level = 10 : i32, message = "bld,bmd->blm"}> : () -> ()
    %cst_16 = arith.constant dense<0.000000e+00> : vector<2x8x8xf32>
    %47 = tpu.matmul %42, %44, %cst_16 {dimension_numbers = #tpu.dot_dimension_numbers<[2], [2], [1], [1], [0, 0, 0, 1, 1, 1], [0], [0]>} : vector<2x8x8xf32>, vector<2x8x8xf32>, vector<2x8x8xf32> -> vector<2x8x8xf32>
    "tpu.trace_stop"() : () -> ()
    %cst_17 = arith.constant dense<0xFF800000> : vector<2x8xf32>
    %48 = vector.multi_reduction <maximumf>, %47, %cst_17 [2] : vector<2x8x8xf32> to vector<2x8xf32>
    %49 = vector.shape_cast %48 : vector<2x8xf32> to vector<2x8x1xf32>
    %50 = vector.broadcast %49 : vector<2x8x1xf32> to vector<2x8x8xf32>
    %51 = arith.subf %47, %50 : vector<2x8x8xf32>
    %52 = math.exp %51 : vector<2x8x8xf32>
    %cst_18 = arith.constant dense<0.000000e+00> : vector<2x8xf32>
    %53 = vector.multi_reduction <add>, %52, %cst_18 [2] : vector<2x8x8xf32> to vector<2x8xf32>
    %54 = vector.shape_cast %53 : vector<2x8xf32> to vector<2x8x1xf32>
    %55 = tpu.reciprocal %54 : vector<2x8x1xf32> -> vector<2x8x1xf32>
    %56 = vector.broadcast %55 : vector<2x8x1xf32> to vector<2x8x8xf32>
    %57 = arith.mulf %52, %56 : vector<2x8x8xf32>
    "tpu.trace_start"() <{level = 10 : i32, message = "blm,bmd->bld"}> : () -> ()
    %cst_19 = arith.constant dense<0.000000e+00> : vector<2x8x8xf32>
    %58 = tpu.matmul %57, %46, %cst_19 {dimension_numbers = #tpu.dot_dimension_numbers<[2], [1], [1], [2], [0, 0, 0, 1, 1, 2], [0], [0]>} : vector<2x8x8xf32>, vector<2x8x8xf32>, vector<2x8x8xf32> -> vector<2x8x8xf32>
    "tpu.trace_stop"() : () -> ()
    %59 = vector.shape_cast %58 : vector<2x8x8xf32> to vector<16x8xf32>
    %60 = vector.extract_strided_slice %20 {offsets = [0, 16], sizes = [16, 8], strides = [1, 1]} : vector<16x32xf32> to vector<16x8xf32>
    %61 = vector.shape_cast %60 : vector<16x8xf32> to vector<2x8x8xf32>
    %62 = vector.extract_strided_slice %21 {offsets = [0, 16], sizes = [16, 8], strides = [1, 1]} : vector<16x32xf32> to vector<16x8xf32>
    %63 = vector.shape_cast %62 : vector<16x8xf32> to vector<2x8x8xf32>
    %64 = vector.extract_strided_slice %19 {offsets = [0, 16], sizes = [16, 8], strides = [1, 1]} : vector<16x32xf32> to vector<16x8xf32>
    %65 = vector.shape_cast %64 : vector<16x8xf32> to vector<2x8x8xf32>
    "tpu.trace_start"() <{level = 10 : i32, message = "bld,bmd->blm"}> : () -> ()
    %cst_20 = arith.constant dense<0.000000e+00> : vector<2x8x8xf32>
    %66 = tpu.matmul %61, %63, %cst_20 {dimension_numbers = #tpu.dot_dimension_numbers<[2], [2], [1], [1], [0, 0, 0, 1, 1, 1], [0], [0]>} : vector<2x8x8xf32>, vector<2x8x8xf32>, vector<2x8x8xf32> -> vector<2x8x8xf32>
    "tpu.trace_stop"() : () -> ()
    %cst_21 = arith.constant dense<0xFF800000> : vector<2x8xf32>
    %67 = vector.multi_reduction <maximumf>, %66, %cst_21 [2] : vector<2x8x8xf32> to vector<2x8xf32>
    %68 = vector.shape_cast %67 : vector<2x8xf32> to vector<2x8x1xf32>
    %69 = vector.broadcast %68 : vector<2x8x1xf32> to vector<2x8x8xf32>
    %70 = arith.subf %66, %69 : vector<2x8x8xf32>
    %71 = math.exp %70 : vector<2x8x8xf32>
    %cst_22 = arith.constant dense<0.000000e+00> : vector<2x8xf32>
    %72 = vector.multi_reduction <add>, %71, %cst_22 [2] : vector<2x8x8xf32> to vector<2x8xf32>
    %73 = vector.shape_cast %72 : vector<2x8xf32> to vector<2x8x1xf32>
    %74 = tpu.reciprocal %73 : vector<2x8x1xf32> -> vector<2x8x1xf32>
    %75 = vector.broadcast %74 : vector<2x8x1xf32> to vector<2x8x8xf32>
    %76 = arith.mulf %71, %75 : vector<2x8x8xf32>
    "tpu.trace_start"() <{level = 10 : i32, message = "blm,bmd->bld"}> : () -> ()
    %cst_23 = arith.constant dense<0.000000e+00> : vector<2x8x8xf32>
    %77 = tpu.matmul %76, %65, %cst_23 {dimension_numbers = #tpu.dot_dimension_numbers<[2], [1], [1], [2], [0, 0, 0, 1, 1, 2], [0], [0]>} : vector<2x8x8xf32>, vector<2x8x8xf32>, vector<2x8x8xf32> -> vector<2x8x8xf32>
    "tpu.trace_stop"() : () -> ()
    %78 = vector.shape_cast %77 : vector<2x8x8xf32> to vector<16x8xf32>
    %79 = vector.extract_strided_slice %20 {offsets = [0, 24], sizes = [16, 8], strides = [1, 1]} : vector<16x32xf32> to vector<16x8xf32>
    %80 = vector.shape_cast %79 : vector<16x8xf32> to vector<2x8x8xf32>
    %81 = vector.extract_strided_slice %21 {offsets = [0, 24], sizes = [16, 8], strides = [1, 1]} : vector<16x32xf32> to vector<16x8xf32>
    %82 = vector.shape_cast %81 : vector<16x8xf32> to vector<2x8x8xf32>
    %83 = vector.extract_strided_slice %19 {offsets = [0, 24], sizes = [16, 8], strides = [1, 1]} : vector<16x32xf32> to vector<16x8xf32>
    %84 = vector.shape_cast %83 : vector<16x8xf32> to vector<2x8x8xf32>
    "tpu.trace_start"() <{level = 10 : i32, message = "bld,bmd->blm"}> : () -> ()
    %cst_24 = arith.constant dense<0.000000e+00> : vector<2x8x8xf32>
    %85 = tpu.matmul %80, %82, %cst_24 {dimension_numbers = #tpu.dot_dimension_numbers<[2], [2], [1], [1], [0, 0, 0, 1, 1, 1], [0], [0]>} : vector<2x8x8xf32>, vector<2x8x8xf32>, vector<2x8x8xf32> -> vector<2x8x8xf32>
    "tpu.trace_stop"() : () -> ()
    %cst_25 = arith.constant dense<0xFF800000> : vector<2x8xf32>
    %86 = vector.multi_reduction <maximumf>, %85, %cst_25 [2] : vector<2x8x8xf32> to vector<2x8xf32>
    %87 = vector.shape_cast %86 : vector<2x8xf32> to vector<2x8x1xf32>
    %88 = vector.broadcast %87 : vector<2x8x1xf32> to vector<2x8x8xf32>
    %89 = arith.subf %85, %88 : vector<2x8x8xf32>
    %90 = math.exp %89 : vector<2x8x8xf32>
    %cst_26 = arith.constant dense<0.000000e+00> : vector<2x8xf32>
    %91 = vector.multi_reduction <add>, %90, %cst_26 [2] : vector<2x8x8xf32> to vector<2x8xf32>
    %92 = vector.shape_cast %91 : vector<2x8xf32> to vector<2x8x1xf32>
    %93 = tpu.reciprocal %92 : vector<2x8x1xf32> -> vector<2x8x1xf32>
    %94 = vector.broadcast %93 : vector<2x8x1xf32> to vector<2x8x8xf32>
    %95 = arith.mulf %90, %94 : vector<2x8x8xf32>
    "tpu.trace_start"() <{level = 10 : i32, message = "blm,bmd->bld"}> : () -> ()
    %cst_27 = arith.constant dense<0.000000e+00> : vector<2x8x8xf32>
    %96 = tpu.matmul %95, %84, %cst_27 {dimension_numbers = #tpu.dot_dimension_numbers<[2], [1], [1], [2], [0, 0, 0, 1, 1, 2], [0], [0]>} : vector<2x8x8xf32>, vector<2x8x8xf32>, vector<2x8x8xf32> -> vector<2x8x8xf32>
    "tpu.trace_stop"() : () -> ()
    %97 = vector.shape_cast %96 : vector<2x8x8xf32> to vector<16x8xf32>
    %98 = tpu.concatenate %40, %59, %78, %97 in 1 : vector<16x8xf32>, vector<16x8xf32>, vector<16x8xf32>, vector<16x8xf32> -> vector<16x32xf32>
    %c0_28 = arith.constant 0 : index
    %c0_29 = arith.constant 0 : index
    %99 = vector.load %arg5[%c0_28, %c0_29] : memref<32x32xf32, #tpu.memory_space<vmem>>, vector<32x32xf32>
    %cst_30 = arith.constant dense<0.000000e+00> : vector<16x32xf32>
    %100 = tpu.matmul %98, %99, %cst_30 {dimension_numbers = #tpu.dot_dimension_numbers<[1], [0], [0], [1], [0, 0, 1, 1], [], []>} : vector<16x32xf32>, vector<32x32xf32>, vector<16x32xf32> -> vector<16x32xf32>
    %101 = vector.extract_strided_slice %9 {offsets = [1, 0], sizes = [1, 32], strides = [1, 1]} : vector<4x32xf32> to vector<1x32xf32>
    %102 = vector.broadcast %101 : vector<1x32xf32> to vector<16x32xf32>
    %103 = arith.addf %100, %102 : vector<16x32xf32>
    %104 = arith.addf %3, %103 : vector<16x32xf32>
    %cst_31 = arith.constant dense<0.000000e+00> : vector<16xf32>
    %105 = vector.multi_reduction <add>, %104, %cst_31 [1] : vector<16x32xf32> to vector<16xf32>
    %106 = vector.shape_cast %105 : vector<16xf32> to vector<16x1xf32>
    %cst_32 = arith.constant 3.200000e+01 : f32
    %107 = vector.broadcast %cst_32 : f32 to vector<16x1xf32>
    %108 = arith.divf %106, %107 : vector<16x1xf32>
    %109 = vector.broadcast %108 : vector<16x1xf32> to vector<16x32xf32>
    %110 = arith.subf %104, %109 : vector<16x32xf32>
    %111 = arith.mulf %110, %110 : vector<16x32xf32>
    %cst_33 = arith.constant dense<0.000000e+00> : vector<16xf32>
    %112 = vector.multi_reduction <add>, %111, %cst_33 [1] : vector<16x32xf32> to vector<16xf32>
    %113 = vector.shape_cast %112 : vector<16xf32> to vector<16x1xf32>
    %cst_34 = arith.constant 3.200000e+01 : f32
    %114 = vector.broadcast %cst_34 : f32 to vector<16x1xf32>
    %115 = arith.divf %113, %114 : vector<16x1xf32>
    %cst_35 = arith.constant 9.99999974E-6 : f32
    %116 = vector.broadcast %cst_35 : f32 to vector<16x1xf32>
    %117 = arith.addf %115, %116 : vector<16x1xf32>
    %118 = math.rsqrt %117 : vector<16x1xf32>
    %119 = vector.broadcast %118 : vector<16x1xf32> to vector<16x32xf32>
    %120 = arith.mulf %110, %119 : vector<16x32xf32>
    %121 = vector.extract_strided_slice %9 {offsets = [2, 0], sizes = [1, 32], strides = [1, 1]} : vector<4x32xf32> to vector<1x32xf32>
    %122 = vector.broadcast %121 : vector<1x32xf32> to vector<16x32xf32>
    %123 = arith.mulf %120, %122 : vector<16x32xf32>
    %124 = vector.extract_strided_slice %9 {offsets = [3, 0], sizes = [1, 32], strides = [1, 1]} : vector<4x32xf32> to vector<1x32xf32>
    %125 = vector.broadcast %124 : vector<1x32xf32> to vector<16x32xf32>
    %126 = arith.addf %123, %125 : vector<16x32xf32>
    %127 = vector.shape_cast %126 : vector<16x32xf32> to vector<2x8x32xf32>
    %128 = tpu.transpose %127, [1, 0, 2] : vector<2x8x32xf32> -> vector<8x2x32xf32>
    %129 = vector.shape_cast %128 : vector<8x2x32xf32> to vector<8x64xf32>
    %c0_36 = arith.constant 0 : index
    %c0_37 = arith.constant 0 : index
    %130 = vector.load %arg8[%c0_36, %c0_37] : memref<8x64xf32, #tpu.memory_space<vmem>>, vector<8x64xf32>
    tpu.vector_store %arg8[%c0_36, %c0_37], %129 {strides = array<i32>} : memref<8x64xf32, #tpu.memory_space<vmem>>, vector<8x64xf32>,
    return
  }
  func.func @transform_0(%arg0: i32) -> (i32, i32) {
    %c0_i32 = arith.constant 0 : i32
    %c0_i32_0 = arith.constant 0 : i32
    return %c0_i32, %arg0 : i32, i32
  }
  func.func @transform_1(%arg0: i32) -> (i32, i32) {
    %c0_i32 = arith.constant 0 : i32
    %c0_i32_0 = arith.constant 0 : i32
    return %c0_i32, %arg0 : i32, i32
  }
  func.func @transform_2(%arg0: i32) -> (i32, i32) {
    %c0_i32 = arith.constant 0 : i32
    %c0_i32_0 = arith.constant 0 : i32
    %c0_i32_1 = arith.constant 0 : i32
    return %c0_i32, %c0_i32_0 : i32, i32
  }
  func.func @transform_3(%arg0: i32) -> (i32, i32) {
    %c0_i32 = arith.constant 0 : i32
    %c0_i32_0 = arith.constant 0 : i32
    %c0_i32_1 = arith.constant 0 : i32
    return %c0_i32, %c0_i32_0 : i32, i32
  }
  func.func @transform_4(%arg0: i32) -> (i32, i32) {
    %c0_i32 = arith.constant 0 : i32
    %c0_i32_0 = arith.constant 0 : i32
    %c0_i32_1 = arith.constant 0 : i32
    return %c0_i32, %c0_i32_0 : i32, i32
  }
  func.func @transform_5(%arg0: i32) -> (i32, i32) {
    %c0_i32 = arith.constant 0 : i32
    %c0_i32_0 = arith.constant 0 : i32
    %c0_i32_1 = arith.constant 0 : i32
    return %c0_i32, %c0_i32_0 : i32, i32
  }
  func.func @transform_6(%arg0: i32) -> (i32, i32) {
    %c0_i32 = arith.constant 0 : i32
    %c0_i32_0 = arith.constant 0 : i32
    %c0_i32_1 = arith.constant 0 : i32
    return %c0_i32, %c0_i32_0 : i32, i32
  }
  func.func @transform_7(%arg0: i32) -> (i32, i32) {
    %c0_i32 = arith.constant 0 : i32
    %c0_i32_0 = arith.constant 0 : i32
    return %c0_i32, %arg0 : i32, i32
  }
}

</mosaic_0001>

<bundles_post_ra>
// kernel: tpu_custom_call.1
= control target key start
LH: loop header
LB: loop body
LE: loop exit
PB: predicated region body
PF: predicated region fallthrough
CT: control target
= control target key end

     0   :  { %12 = vsyncpa [#allocation3], 0  ;;  %s2945_s0 = inlined_call_operand.hbm [shape: f32[8,64], index: 0, kind: input, shape index: {}]   ;;  %s2946_s1 = inlined_call_operand.hbm [shape: f32[8,64], index: 1, kind: input, shape index: {}]   ;;  %s2947_s2 = inlined_call_operand.hbm [shape: f32[32,64], index: 2, kind: input, shape index: {}]   ;;  %s2948_s3 = inlined_call_operand.hbm [shape: f32[32,32], index: 3, kind: input, shape index: {}]   ;;  %s2949_s4 = inlined_call_operand.hbm [shape: f32[32,32], index: 4, kind: input, shape index: {}]   ;;  %s2950_s5 = inlined_call_operand.vmem [shape: f32[1,64], index: 5, kind: input, shape index: {}]   ;;  %s2951_s6 = inlined_call_operand.vmem [shape: f32[4,32], index: 6, kind: input, shape index: {}]   ;;  %s2952_s7 = inlined_call_operand.hbm [shape: f32[8,64], index: 7, kind: output, shape index: {}]  }
   0x1   :  { %13 = vsyncpa [#allocation6], 0 }
   0x2   :  { %14 = vsyncpa [#allocation9], 0 }
   0x3   :  { %15 = vsyncpa [#allocation4], 0  ;;  %s2557_s24 = smov [#allocation5]   ;;  %s2417_s28 = scalar_lea.hbm %s2946_s1, 128 }
   0x4   :  { %s32_s25 = sshll.u32 %s2557_s24, 4  ;;  %p2418_p0 = scmp.ne.s32.totalorder %s2946_s1, %s2417_s28  ;;  %s33_s25 = int_to_ptr.vmem [resolvable:$true] %s32_s25 }
   0x5   :  { %p2421_p1 = scmp.lt.u32.totalorder %s2417_s28, %s2946_s1 }
   0x7   :  { %p2423_p2 = pnand %p2421_p1, %p2418_p0 }
   0x9   :  { %2426 = shalt.err (!%p2423_p2)
}
   0xa   :  { %s2427_s10 = scalar_lea.vmem %s33_s25, 128  ;;  %p2432_p4 = scmp.lt.s32.totalorder %s33_s25, %s33_s25 }
   0xb   :  { %p2428_p3 = scmp.ne.s32.totalorder %s33_s25, %s2427_s10  ;;  %p2433_p5 = scmp.lt.s32.totalorder %s2427_s10, %s2427_s10 }
   0xd   :  { %p2434_p6 = por %p2433_p5, %p2432_p4 }
   0xf   :  { %p2435_p7 = pnand %p2434_p6, %p2428_p3 }
  0x11   :  { %2438 = shalt.err (!%p2435_p7)
}
  0x12   :  { %35 = dma.hbm_to_vmem [thread:$0]  %s2946_s1, 128, %s33_s25, [#allocation6]  }
  0x13   :  { %s2558_s13 = smov [#allocation8]   ;;  %s2559_s15 = smov [#allocation2]  }
  0x14   :  { %s53_s14 = sshll.u32 %s2558_s13, 4  ;;  %s22_s16 = sshll.u32 %s2559_s15, 4  ;;  %s54_s14 = int_to_ptr.vmem [resolvable:$true] %s53_s14  ;;  %s23_s16 = int_to_ptr.vmem [resolvable:$true] %s22_s16 }
  0x15   :  { %s2439_s19 = scalar_lea.hbm %s2948_s3, 512 }
  0x16   :  { %p2440_p8 = scmp.ne.s32.totalorder %s2948_s3, %s2439_s19  ;;  %p2443_p9 = scmp.lt.u32.totalorder %s2439_s19, %s2948_s3 }
  0x18   :  { %p2445_p10 = pnand %p2443_p9, %p2440_p8 }
  0x1a   :  { %2448 = shalt.err (!%p2445_p10)
}
  0x1b   :  { %s2449_s1 = scalar_lea.vmem %s54_s14, 512  ;;  %p2454_p12 = scmp.lt.s32.totalorder %s54_s14, %s54_s14 }
  0x1c   :  { %p2450_p11 = scmp.ne.s32.totalorder %s54_s14, %s2449_s1  ;;  %p2455_p13 = scmp.lt.s32.totalorder %s2449_s1, %s2449_s1 }
  0x1e   :  { %p2456_p0 = por %p2455_p13, %p2454_p12 }
  0x20   :  { %p2457_p1 = pnand %p2456_p0, %p2450_p11 }
  0x22   :  { %2460 = shalt.err (!%p2457_p1)
}
  0x23   :  { %s2560_s24 = smov 128   ;;  %s2561_s25 = smov 8  }
  0x24   :  { %59 = dma.hbm_to_vmem [thread:$0]  %s2948_s3, 512, %s54_s14, [#allocation9], %s2560_s24, %s2560_s24, %s2561_s25  }
  0x25   :  { %s2461_s30 = scalar_lea.hbm %s2945_s0, 128 }
  0x26   :  { %p2462_p2 = scmp.ne.s32.totalorder %s2945_s0, %s2461_s30  ;;  %p2465_p3 = scmp.lt.u32.totalorder %s2461_s30, %s2945_s0 }
  0x28   :  { %p2467_p4 = pnand %p2465_p3, %p2462_p2 }
  0x2a   :  { %2470 = shalt.err (!%p2467_p4)
}
  0x2b   :  { %s2471_s12 = scalar_lea.vmem %s23_s16, 128  ;;  %p2476_p6 = scmp.lt.s32.totalorder %s23_s16, %s23_s16 }
  0x2c   :  { %p2472_p5 = scmp.ne.s32.totalorder %s23_s16, %s2471_s12  ;;  %p2477_p7 = scmp.lt.s32.totalorder %s2471_s12, %s2471_s12 }
  0x2e   :  { %p2478_p8 = por %p2477_p7, %p2476_p6 }
  0x30   :  { %p2479_p9 = pnand %p2478_p8, %p2472_p5 }
  0x32   :  { %2482 = shalt.err (!%p2479_p9)
}
  0x33   :  { %25 = dma.hbm_to_vmem [thread:$0]  %s2945_s0, 128, %s23_s16, [#allocation3]  }
  0x34   :  { %s2562_s14 = smov [#allocation7]   ;;  %s2563_s17 = smov [#allocation10]  }
  0x35   :  { %s41_s15 = sshll.u32 %s2562_s14, 4  ;;  %s65_s18 = sshll.u32 %s2563_s17, 4  ;;  %s42_s15 = int_to_ptr.vmem [resolvable:$true] %s41_s15  ;;  %s66_s18 = int_to_ptr.vmem [resolvable:$true] %s65_s18 }
  0x36   :  { %s2483_s21 = scalar_lea.hbm %s2947_s2, 512 }
  0x37   :  { %p2484_p10 = scmp.ne.s32.totalorder %s2947_s2, %s2483_s21  ;;  %p2487_p11 = scmp.lt.u32.totalorder %s2483_s21, %s2947_s2 }
  0x39   :  { %p2489_p12 = pnand %p2487_p11, %p2484_p10 }
  0x3b   :  { %2492 = shalt.err (!%p2489_p12)
}
  0x3c   :  { %s2493_s0 = scalar_lea.vmem %s42_s15, 512  ;;  %p2498_p0 = scmp.lt.s32.totalorder %s42_s15, %s42_s15 }
  0x3d   :  { %p2494_p13 = scmp.ne.s32.totalorder %s42_s15, %s2493_s0  ;;  %p2499_p1 = scmp.lt.s32.totalorder %s2493_s0, %s2493_s0 }
  0x3f   :  { %p2500_p2 = por %p2499_p1, %p2498_p0 }
  0x41   :  { %p2501_p3 = pnand %p2500_p2, %p2494_p13 }
  0x43   :  { %2504 = shalt.err (!%p2501_p3)
}
  0x44   :  { %47 = dma.hbm_to_vmem [thread:$0]  %s2947_s2, 512, %s42_s15, [#allocation6], %s2560_s24, %s2560_s24, %s2561_s25  }
  0x45   :  { %s2505_s30 = scalar_lea.hbm %s2949_s4, 512 }
  0x46   :  { %p2506_p4 = scmp.ne.s32.totalorder %s2949_s4, %s2505_s30  ;;  %p2509_p5 = scmp.lt.u32.totalorder %s2505_s30, %s2949_s4 }
  0x48   :  { %p2511_p6 = pnand %p2509_p5, %p2506_p4 }
  0x4a   :  { %2514 = shalt.err (!%p2511_p6)
}
  0x4b   :  { %s2515_s12 = scalar_lea.vmem %s66_s18, 512  ;;  %p2520_p8 = scmp.lt.s32.totalorder %s66_s18, %s66_s18 }
  0x4c   :  { %p2516_p7 = scmp.ne.s32.totalorder %s66_s18, %s2515_s12  ;;  %p2521_p9 = scmp.lt.s32.totalorder %s2515_s12, %s2515_s12 }
  0x4e   :  { %p2522_p10 = por %p2521_p9, %p2520_p8 }
  0x50   :  { %p2523_p11 = pnand %p2522_p10, %p2516_p7 }
  0x52   :  { %2526 = shalt.err (!%p2523_p11)
}
  0x53   :  { %71 = dma.hbm_to_vmem [thread:$0]  %s2949_s4, 512, %s66_s18, [#allocation9], %s2560_s24, %s2560_s24, %s2561_s25  }
  0x54   :  { %2549 = dma.done.wait [#allocation3], 128  }
  0x55   :  { %2550 = vsyncadd [#allocation3], 4294967168 }
  0x56   :  { %2551 = dma.done.wait [#allocation6], 640  }
  0x57   :  { %2552 = vsyncadd [#allocation6], 4294966656 }
  0x58   :  { %2553 = dma.done.wait [#allocation9], 1024  }
  0x59   :  { %2554 = vsyncadd [#allocation9], 4294966272  ;;  %v91_v0 = vld [vmem:[#allocation2] sm:$0xff]  ;;  %v429_v1 = vld [vmem:[#allocation8] sm:$0xff]  ;;  %s2564_s13 = smov 96   ;;  %v2565_v14 = vmov 0.0   ;;  %v100_v17 = vlaneseq }
  0x5a   :  { %93 = vrot.lane.b32.xlu0 %v91_v0, %s2564_s13  ;;  %v430_v2 = vld [vmem:[#allocation8 + $0x8] sm:$0xff]  ;;  %v431_v3 = vld [vmem:[#allocation8 + $0x10] sm:$0xff]  ;;  %v432_v4 = vld [vmem:[#allocation8 + $0x18] sm:$0xff]  ;;  %v2566_v15 = vmov 1983009808   ;;  %v96_v23 = vcombine.high %v91_v0, %v2565_v14  ;;  %vm347_vm0 = vcmask 261120  }
  0x5b   :  { %v212_v5 = vld [vmem:[#allocation5] sm:$0xff]  ;;  %v2343_v6 = vpack.c.bf16 %v430_v2, %v429_v1  ;;  %v2347_v7 = vpack.c.bf16 %v432_v4, %v431_v3  ;;  %v336_v8 = vld [vmem:[#allocation7] sm:$0xff]  ;;  %v337_v9 = vld [vmem:[#allocation7 + $0x8] sm:$0xff]  ;;  %v98_v16 = vunpack.c.l.s4 %v2566_v15  ;;  %v2692_v19 = vshrl.u32 %v100_v17, 7  ;;  %s2570_s15 = smov 120   ;;  %s2571_s17 = smov 80  }
  0x5c   :  { %v2335_v10 = vpack.c.bf16 %v337_v9, %v336_v8  ;;  %v338_v11 = vld [vmem:[#allocation7 + $0x10] sm:$0xff]  ;;  %v339_v12 = vld [vmem:[#allocation7 + $0x18] sm:$0xff]  ;;  %v2567_v20 = vmov 1934713408   ;;  %v217_v31 = vcombine.high %v212_v5, %v2565_v14  ;;  %vm2568_vm1 = vmmov 0   ;;  %s2572_s18 = smov 112  }
  0x5d   :  { %2344 = vmatprep.subr.bf16.mxu1 %v2343_v6  ;;  %v2339_v13 = vpack.c.bf16 %v339_v12, %v338_v11  ;;  %v99_v18 = vunpack.c.0.s8 %v98_v16  ;;  %v129_v21 = vunpack.c.l.s4 %v2567_v20  ;;  %vm521_vm2 = vcmask 64512   ;;  %s2573_s19 = smov 72   ;;  %s2574_s20 = smov 104  }
  0x5e   :  { %214 = vrot.lane.b32.xlu0 %v212_v5, %s2564_s13  ;;  %2346 = vmatpush3.bf16.msra.mxu1 %v2343_v6  ;;  %s2575_s21 = smov 16   ;;  %vm1862_vm3 = vcmask 195584   ;;  %vm1859_vm4 = vcmask 130048   ;;  %s2577_s22 = smov 32   ;;  %vm2116_vm5 = vcmask 523264  }
  0x5f   :  { %2348 = vmatprep.subr.bf16.mxu1 %v2347_v7  ;;  %2336 = vmatprep.subr.bf16.mxu0 %v2335_v10  ;;  %v2695_v22 = vsub.s32 %v99_v18, %v2692_v19  ;;  %v130_v24 = vunpack.c.0.s8 %v129_v21  ;;  %s2578_s23 = smov [#allocation11]  }
  0x60   :  { %2338 = vmatpush3.bf16.msra.mxu0 %v2335_v10  ;;  %s2124_s1 = sshll.u32 %s2578_s23, 4  ;;  %s2125_s1 = int_to_ptr.vmem [resolvable:$true] %s2124_s1 }
  0x61   :  { %2340 = vmatprep.subr.bf16.mxu0 %v2339_v13  ;;  %v103_v25 = vrot.slane %v91_v0, %v2695_v22  ;;  %v110_v27 = vrot.slane %v96_v23, %v2695_v22  ;;  %v2701_v28 = vsub.s32 %v130_v24, %v2692_v19  ;;  %v224_v35 = vrot.slane %v212_v5, %v2695_v22  ;;  %s2527_s26 = scalar_lea.vmem %s2125_s1, 128  ;;  %p2532_p13 = scmp.lt.s32.totalorder %s2125_s1, %s2125_s1 }
  0x62   :  { %2350 = vmatpush3.bf16.msra.mxu1 %v2347_v7  ;;  %v231_v41 = vrot.slane %v217_v31, %v2695_v22  ;;  %v435_v24 = vsub.s32 0, %v2692_v19  ;;  %p2528_p12 = scmp.ne.s32.totalorder %s2125_s1, %s2527_s26  ;;  %p2533_p0 = scmp.lt.s32.totalorder %s2527_s26, %s2527_s26 }
  0x63   :  { %2244 = vmatprep.subr.mxu1 %v2565_v14 }
  0x64   :  { %2342 = vmatpush3.bf16.msra.mxu0 %v2339_v13  ;;  %p2534_p1 = por %p2533_p0, %p2532_p13 }
  0x65   :  { %2254 = vmatprep.subr.mxu0 %v2565_v14 }
  0x66   :  { %p2535_p2 = pnand %p2534_p1, %p2528_p12 }
  0xcc   :  { %v94_v26 = vpop.permute.xlu0 %93 }
  0xcd   :  { %v111_v29 = vcombine.high %v94_v26, %v2565_v14  ;;  %v118_v30 = vrot.slane %v94_v26, %v2695_v22 }
  0xcf   :  { %v125_v32 = vrot.slane %v111_v29, %v2695_v22  ;;  %v126_v33 = vcombine.low %v103_v25, %v118_v30  ;;  %v127_v34 = vcombine.high %v103_v25, %v118_v30  ;;  %v2748_v25 = vld [vmem:[%s2951_s6] sm:$0xf] }
  0xd0   :  { %v215_v36 = vpop.permute.xlu0 %214  ;;  %v436_v26 = vrot.slane %v2748_v25, %v435_v24 }
  0xd1   :  { %v134_v37 = vrot.slane %v126_v33, %v2701_v28  ;;  %v141_v38 = vrot.slane %v127_v34, %v2701_v28  ;;  %v142_v39 = vcombine.low %v110_v27, %v125_v32  ;;  %v143_v40 = vcombine.high %v110_v27, %v125_v32  ;;  %v2139_v32 = vld [vmem:[%s2950_s5] ss:$0 sm:$0xff]  ;;  %s2569_s5 = smov 88  }
  0xd2   :  { %v232_v42 = vcombine.high %v215_v36, %v2565_v14  ;;  %v239_v43 = vrot.slane %v215_v36, %v2695_v22 }
  0xd3   :  { %v150_v44 = vrot.slane %v142_v39, %v2701_v28  ;;  %v157_v45 = vrot.slane %v143_v40, %v2701_v28  ;;  %v162_v46 = vcombine.low %v134_v37, %v141_v38  ;;  %v2135_v47 = vcombine.high %v134_v37, %v141_v38 }
  0xd4   :  { %v246_v48 = vrot.slane %v232_v42, %v2695_v22  ;;  %v247_v49 = vcombine.low %v224_v35, %v239_v43  ;;  %v248_v50 = vcombine.high %v224_v35, %v239_v43 }
  0xd5   :  { %v169_v51 = vrot.slane %v162_v46, %v2695_v22  ;;  %v177_v52 = vrot.slane %v2135_v47, %v2695_v22  ;;  %v178_v53 = vcombine.low %v150_v44, %v157_v45  ;;  %v2136_v54 = vcombine.high %v150_v44, %v157_v45 }
  0xd6   :  { %v255_v55 = vrot.slane %v247_v49, %v2701_v28  ;;  %v262_v56 = vrot.slane %v248_v50, %v2701_v28  ;;  %v263_v57 = vcombine.low %v231_v41, %v246_v48  ;;  %v264_v58 = vcombine.high %v231_v41, %v246_v48 }
  0xd7   :  { %v185_v59 = vrot.slane %v178_v53, %v2695_v22  ;;  %v193_v60 = vrot.slane %v2136_v54, %v2695_v22  ;;  %v194_v61 = vcombine.low %v169_v51, %v177_v52 }
  0xd8   :  { %v271_v62 = vrot.slane %v263_v57, %v2701_v28  ;;  %v278_v63 = vrot.slane %v264_v58, %v2701_v28  ;;  %v283_v0 = vcombine.low %v255_v55, %v262_v56  ;;  %v2137_v1 = vcombine.high %v255_v55, %v262_v56 }
  0xd9   :  { %v202_v2 = vcombine.low %v185_v59, %v193_v60  ;;  %v201_v7 = vrot.slane %v194_v61, %v2701_v28 }
  0xda   :  { %v299_v3 = vcombine.low %v271_v62, %v278_v63  ;;  %v2138_v4 = vcombine.high %v271_v62, %v278_v63  ;;  %v290_v5 = vrot.slane %v283_v0, %v2695_v22  ;;  %v298_v6 = vrot.slane %v2137_v1, %v2695_v22 }
  0xdb   :  { %v209_v8 = vrot.slane %v202_v2, %v2701_v28 }
  0xdc   :  { %v306_v9 = vrot.slane %v299_v3, %v2695_v22  ;;  %v314_v10 = vrot.slane %v2138_v4, %v2695_v22  ;;  %v315_v11 = vcombine.low %v290_v5, %v298_v6 }
  0xdd   :  { %v2730_v12 = vcombine.low %v201_v7, %v209_v8  ;;  %v2732_v13 = vcombine.high %v201_v7, %v209_v8 }
  0xde   :  { %v323_v15 = vcombine.low %v306_v9, %v314_v10  ;;  %v322_v16 = vrot.slane %v315_v11, %v2701_v28 }
  0xdf   :  { %2241 = vmatprep.mubr.msk.f32.mxu1 %vm347_vm0, %v2730_v12 }
  0xe0   :  { %2242 = vmatmul.mubr.msk.f32.vlgmr.msra.gmra.mrb[0].mxu1 %vm347_vm0, %v2732_v13  ;;  %v330_v17 = vrot.slane %v323_v15, %v2701_v28 }
  0xe1   :  { %2246 = vmatprep.mubr.msk.f32.mxu1 %vm2568_vm1, %v2565_v14 }
  0xe2   :  { %v331_v18 = vcombine.low %v322_v16, %v330_v17  ;;  %v332_v20 = vcombine.high %v322_v16, %v330_v17 }
  0xe4   :  { %v333_v21 = vadd.f32 %v331_v18, %v2730_v12  ;;  %v334_v23 = vadd.f32 %v332_v20, %v2732_v13 }
  0xe6   :  { %2230 = vmatprep.mubr.msk.f32.mxu0 %vm347_vm0, %v333_v21 }
  0xe7   :  { %2231 = vmatmul.mubr.msk.f32.vlgmr.msra.gmra.mrb[0].mxu0 %vm347_vm0, %v334_v23 }
  0xe8   :  { %2256 = vmatprep.mubr.msk.f32.mxu0 %vm2568_vm1, %v2565_v14 }
 0x1b3   :  { %v2243_v27 = vpop.f32.mrb[0].mxu1 }
 0x1b4   :  { %v2755_v29 = vadd.f32 %v2243_v27, %v436_v26  ;;  %v509_v30 = vpop.f32.mrb[1].mxu1 }
 0x1b5   :  { %v2757_v31 = vadd.f32 %v509_v30, %v436_v26 }
 0x1b7   :  { %2255 = vmatpush3.msra.mxu0 %v2757_v31 }
 0x1b8   :  { %2264 = vmatprep.subr.mxu0 %v2565_v14 }
 0x1ba   :  { %v2232_v33 = vpop.f32.mrb[0].mxu0 }
 0x1bb   :  { %v420_v34 = vpop.f32.mrb[1].mxu0  ;;  %v2768_v36 = vadd.f32 %v2232_v33, %v2139_v32 }
 0x1bc   :  { %v2764_v35 = vadd.f32 %v2139_v32, %v420_v34 }
 0x1be   :  { %519 = vrot.lane.b32.xlu1 %v2764_v35, %s2564_s13 }
 0x1c2   :  { %597 = vrot.lane.b32.xlu1 %v2768_v36, %s2564_s13 }
 0x230   :  { %v520_v37 = vpop.permute.xlu1 %519 }
 0x231   :  { %2245 = vmatpush3.xpose.msk.msra.mxu1 %vm521_vm2, %v520_v37 }
 0x232   :  { %2249 = vmatprep.subr.mxu1 %v2565_v14 }
 0x234   :  { %2247 = vmatmul.mubr.msk.f32.vlgmr.msra.gmra.mrb[2].mxu1 %vm521_vm2, %v2764_v35  ;;  %v598_v38 = vpop.permute.xlu1 %597 }
 0x235   :  { %2250 = vmatpush3.xpose.msk.msra.mxu1 %vm521_vm2, %v598_v38  ;;  %2251 = vmatprep.mubr.msk.f32.mxu1 %vm2568_vm1, %v2565_v14 }
 0x236   :  { %2259 = vmatprep.subr.mxu1 %v2565_v14 }
 0x238   :  { %2252 = vmatmul.mubr.msk.f32.vlgmr.msra.gmra.mrb[4].mxu1 %vm521_vm2, %v2768_v36 }
 0x239   :  { %2260 = vmatpush3.msra.mxu1 %v2755_v29  ;;  %2261 = vmatprep.mubr.msk.f32.mxu1 %vm2568_vm1, %v2565_v14 }
 0x23a   :  { %2269 = vmatprep.subr.mxu1 %v2565_v14 }
 0x307   :  { %v592_v39 = vpop.f32.mrb[2].mxu1 }
 0x308   :  { %v2248_v40 = vpop.f32.mrb[3].mxu1  ;;  %v673_v41 = vsel %vm521_vm2, %v592_v39, -inf }
 0x309   :  { %674 = vmax.xlane.f32.xlu0 %v673_v41 }
 0x30b   :  { %v669_v42 = vpop.f32.mrb[4].mxu1 }
 0x30c   :  { %v2253_v43 = vpop.f32.mrb[5].mxu1  ;;  %v676_v44 = vsel %vm521_vm2, %v669_v42, -inf }
 0x30d   :  { %677 = vmax.xlane.f32.xlu1 %v676_v44 }
 0x31e   :  { %843 = vrot.lane.b32.xlu1 %v2764_v35, %s2569_s5 }
 0x322   :  { %841 = vrot.lane.b32.xlu1 %v2764_v35, %s2570_s15 }
 0x326   :  { %919 = vrot.lane.b32.xlu1 %v2768_v36, %s2570_s15 }
 0x396   :  { %v675_v45 = vpop.xlane.xlu0 %674 }
 0x397   :  { %v679_v46 = vsub.f32 %v592_v39, %v675_v45 }
 0x399   :  { %v681_v47 = vmul.f32 1.442695, %v679_v46 }
 0x39a   :  { %v678_v48 = vpop.xlane.xlu1 %677 }
 0x39b   :  { %2381 = vpow2.f32 %v681_v47  ;;  %v680_v49 = vsub.f32 %v669_v42, %v678_v48 }
 0x39d   :  { %v683_v50 = vmul.f32 1.442695, %v680_v49 }
 0x39e   :  { %v844_v57 = vpop.permute.xlu1 %843 }
 0x39f   :  { %2383 = vpow2.f32 %v683_v50 }
 0x3a2   :  { %v842_v61 = vpop.permute.xlu1 %841 }
 0x3a5   :  { %v2382_v51 = vpop.eup %2381 }
 0x3a6   :  { %v685_v52 = vsel %vm521_vm2, %v2382_v51, 0.0  ;;  %v920_v0 = vpop.permute.xlu1 %919 }
 0x3a7   :  { %686 = vadd.xlane.f32.xlu0 %v685_v52 }
 0x3a9   :  { %v2384_v53 = vpop.eup %2383 }
 0x3aa   :  { %v688_v54 = vsel %vm521_vm2, %v2384_v53, 0.0 }
 0x3ab   :  { %689 = vadd.xlane.f32.xlu0 %v688_v54 }
 0x3c1   :  { %921 = vrot.lane.b32.xlu0 %v2768_v36, %s2569_s5 }
 0x434   :  { %v687_v55 = vpop.xlane.xlu0 %686 }
 0x435   :  { %2385 = vrcp.f32 %v687_v55 }
 0x438   :  { %v690_v56 = vpop.xlane.xlu0 %689 }
 0x439   :  { %2387 = vrcp.f32 %v690_v56 }
 0x43c   :  { %v922_v63 = vpop.permute.xlu0 %921 }
 0x43f   :  { %v2386_v58 = vpop.eup %2385 }
 0x440   :  { %v693_v59 = vmul.f32 %v2386_v58, %v2382_v51 }
 0x442   :  { %2257 = vmatmul.mubr.msk.f32.vlgmr.msra.gmra.mrb[2].mxu0 %vm521_vm2, %v693_v59 }
 0x443   :  { %v2388_v60 = vpop.eup %2387  ;;  %2265 = vmatpush3.xpose.msk.msra.mxu0 %vm521_vm2, %v844_v57  ;;  %2266 = vmatprep.mubr.msk.f32.mxu0 %vm2568_vm1, %v2565_v14 }
 0x444   :  { %v694_v62 = vmul.f32 %v2388_v60, %v2384_v53  ;;  %2274 = vmatprep.subr.mxu0 %v2565_v14 }
 0x446   :  { %2262 = vmatmul.mubr.msk.f32.vlgmr.msra.gmra.mrb[6].mxu1 %vm521_vm2, %v694_v62  ;;  %2267 = vmatmul.mubr.msk.f32.vlgmr.msra.gmra.mrb[4].mxu0 %vm521_vm2, %v842_v61 }
 0x447   :  { %2270 = vmatpush3.xpose.msk.msra.mxu1 %vm521_vm2, %v922_v63  ;;  %2271 = vmatprep.mubr.msk.f32.mxu1 %vm2568_vm1, %v2565_v14 }
 0x448   :  { %2279 = vmatprep.subr.mxu1 %v2565_v14  ;;  %2276 = vmatprep.mubr.msk.f32.mxu0 %vm2568_vm1, %v2565_v14 }
 0x44a   :  { %2272 = vmatmul.mubr.msk.f32.vlgmr.msra.gmra.mrb[8].mxu1 %vm521_vm2, %v920_v0 }
 0x44b   :  { %2281 = vmatprep.mubr.msk.f32.mxu1 %vm2568_vm1, %v2565_v14 }
 0x515   :  { %v2812_v1 = vpop.f32.mrb[2].mxu0 }
 0x516   :  { %v2258_v2 = vpop.f32.mrb[3].mxu0 }
 0x519   :  { %v2814_v3 = vpop.f32.mrb[6].mxu1  ;;  %v915_v4 = vpop.f32.mrb[4].mxu0 }
 0x51a   :  { %v2263_v5 = vpop.f32.mrb[7].mxu1  ;;  %v2268_v6 = vpop.f32.mrb[5].mxu0  ;;  %v997_v7 = vsel %vm521_vm2, %v915_v4, -inf }
 0x51b   :  { %998 = vmax.xlane.f32.xlu0 %v997_v7 }
 0x51d   :  { %v993_v8 = vpop.f32.mrb[8].mxu1 }
 0x51e   :  { %v2273_v9 = vpop.f32.mrb[9].mxu1  ;;  %v1000_v10 = vsel %vm521_vm2, %v993_v8, -inf }
 0x51f   :  { %1001 = vmax.xlane.f32.xlu1 %v1000_v10 }
 0x530   :  { %1020 = vrot.lane.b32.xlu1 %v2757_v31, %s2570_s15 }
 0x531   :  { %1097 = vrot.lane.b32.xlu0 %v2755_v29, %s2570_s15 }
 0x534   :  { %1175 = vrot.lane.b32.xlu1 %v2764_v35, %s2571_s17 }
 0x538   :  { %1253 = vrot.lane.b32.xlu1 %v2768_v36, %s2571_s17 }
 0x53c   :  { %1251 = vrot.lane.b32.xlu1 %v2768_v36, %s2572_s18 }
 0x5a8   :  { %v999_v11 = vpop.xlane.xlu0 %998 }
 0x5a9   :  { %v1003_v15 = vsub.f32 %v915_v4, %v999_v11 }
 0x5ab   :  { %v1005_v16 = vmul.f32 1.442695, %v1003_v15 }
 0x5ac   :  { %v1098_v17 = vpop.permute.xlu0 %1097  ;;  %v1002_v18 = vpop.xlane.xlu1 %1001 }
 0x5ad   :  { %2389 = vpow2.f32 %v1005_v16  ;;  %v1004_v20 = vsub.f32 %v993_v8, %v1002_v18  ;;  %2280 = vmatpush3.msra.mxu1 %v1098_v17 }
 0x5ae   :  { %2289 = vmatprep.subr.mxu1 %v2565_v14 }
 0x5af   :  { %v1007_v21 = vmul.f32 1.442695, %v1004_v20 }
 0x5b0   :  { %v1021_v23 = vpop.permute.xlu1 %1020 }
 0x5b1   :  { %2391 = vpow2.f32 %v1007_v21  ;;  %2275 = vmatpush3.msra.mxu0 %v1021_v23 }
 0x5b2   :  { %2284 = vmatprep.subr.mxu0 %v2565_v14 }
 0x5b4   :  { %v1176_v34 = vpop.permute.xlu1 %1175 }
 0x5b7   :  { %v2390_v24 = vpop.eup %2389 }
 0x5b8   :  { %v1009_v26 = vsel %vm521_vm2, %v2390_v24, 0.0  ;;  %v1254_v40 = vpop.permute.xlu1 %1253 }
 0x5b9   :  { %1010 = vadd.xlane.f32.xlu0 %v1009_v26 }
 0x5bb   :  { %v2392_v27 = vpop.eup %2391 }
 0x5bc   :  { %v1012_v30 = vsel %vm521_vm2, %v2392_v27, 0.0  ;;  %v1252_v43 = vpop.permute.xlu1 %1251 }
 0x5bd   :  { %1013 = vadd.xlane.f32.xlu0 %v1012_v30 }
 0x5d3   :  { %1173 = vrot.lane.b32.xlu0 %v2764_v35, %s2572_s18 }
 0x646   :  { %v1011_v32 = vpop.xlane.xlu0 %1010 }
 0x647   :  { %2393 = vrcp.f32 %v1011_v32 }
 0x64a   :  { %v1014_v33 = vpop.xlane.xlu0 %1013 }
 0x64b   :  { %2395 = vrcp.f32 %v1014_v33 }
 0x64e   :  { %v1174_v42 = vpop.permute.xlu0 %1173 }
 0x651   :  { %v2394_v37 = vpop.eup %2393 }
 0x652   :  { %v1017_v38 = vmul.f32 %v2394_v37, %v2390_v24 }
 0x654   :  { %2277 = vmatmul.mubr.msk.f32.vlgmr.msra.gmra.mrb[6].mxu0 %vm521_vm2, %v1017_v38 }
 0x655   :  { %v2396_v39 = vpop.eup %2395  ;;  %2285 = vmatpush3.xpose.msk.msra.mxu0 %vm521_vm2, %v1176_v34  ;;  %2286 = vmatprep.mubr.msk.f32.mxu0 %vm2568_vm1, %v2565_v14 }
 0x656   :  { %v1018_v41 = vmul.f32 %v2396_v39, %v2392_v27  ;;  %2294 = vmatprep.subr.mxu0 %v2565_v14 }
 0x658   :  { %2282 = vmatmul.mubr.msk.f32.vlgmr.msra.gmra.mrb[10].mxu1 %vm521_vm2, %v1018_v41  ;;  %2287 = vmatmul.mubr.msk.f32.vlgmr.msra.gmra.mrb[8].mxu0 %vm521_vm2, %v1174_v42 }
 0x659   :  { %2290 = vmatpush3.xpose.msk.msra.mxu1 %vm521_vm2, %v1254_v40  ;;  %2291 = vmatprep.mubr.msk.f32.mxu1 %vm2568_vm1, %v2565_v14 }
 0x65a   :  { %2299 = vmatprep.subr.mxu1 %v2565_v14  ;;  %2296 = vmatprep.mubr.msk.f32.mxu0 %vm2568_vm1, %v2565_v14 }
 0x65c   :  { %2292 = vmatmul.mubr.msk.f32.vlgmr.msra.gmra.mrb[12].mxu1 %vm521_vm2, %v1252_v43 }
 0x65d   :  { %2301 = vmatprep.mubr.msk.f32.mxu1 %vm2568_vm1, %v2565_v14 }
 0x727   :  { %v2848_v44 = vpop.f32.mrb[6].mxu0 }
 0x728   :  { %v2278_v45 = vpop.f32.mrb[7].mxu0 }
 0x72b   :  { %v2850_v46 = vpop.f32.mrb[10].mxu1  ;;  %v1247_v47 = vpop.f32.mrb[8].mxu0 }
 0x72c   :  { %v2283_v48 = vpop.f32.mrb[11].mxu1  ;;  %v2288_v49 = vpop.f32.mrb[9].mxu0  ;;  %v1329_v50 = vsel %vm521_vm2, %v1247_v47, -inf }
 0x72d   :  { %1330 = vmax.xlane.f32.xlu0 %v1329_v50  ;;  %v1865_v50 = vld [vmem:[#allocation10] sm:$0xff] }
 0x72f   :  { %v1325_v51 = vpop.f32.mrb[12].mxu1 }
 0x730   :  { %v2293_v52 = vpop.f32.mrb[13].mxu1  ;;  %v1332_v53 = vsel %vm521_vm2, %v1325_v51, -inf }
 0x731   :  { %1333 = vmax.xlane.f32.xlu1 %v1332_v53  ;;  %v1868_v53 = vld [vmem:[#allocation10 + $0x18] sm:$0xff] }
 0x742   :  { %1351 = vrot.lane.b32.xlu1 %v2757_v31, %s2572_s18 }
 0x743   :  { %1427 = vrot.lane.b32.xlu0 %v2755_v29, %s2572_s18 }
 0x746   :  { %1505 = vrot.lane.b32.xlu1 %v2764_v35, %s2573_s19 }
 0x74a   :  { %1583 = vrot.lane.b32.xlu1 %v2768_v36, %s2573_s19 }
 0x74e   :  { %1581 = vrot.lane.b32.xlu1 %v2768_v36, %s2574_s20 }
 0x7ba   :  { %v1331_v54 = vpop.xlane.xlu0 %1330 }
 0x7bb   :  { %v1335_v55 = vsub.f32 %v1247_v47, %v1331_v54 }
 0x7bd   :  { %v1337_v56 = vmul.f32 1.442695, %v1335_v55 }
 0x7be   :  { %v1428_v57 = vpop.permute.xlu0 %1427  ;;  %v1334_v58 = vpop.xlane.xlu1 %1333 }
 0x7bf   :  { %2397 = vpow2.f32 %v1337_v56  ;;  %v1336_v59 = vsub.f32 %v1325_v51, %v1334_v58  ;;  %2300 = vmatpush3.msra.mxu1 %v1428_v57  ;;  %v1866_v51 = vld [vmem:[#allocation10 + $0x8] sm:$0xff] }
 0x7c0   :  { %2309 = vmatprep.subr.mxu1 %v2565_v14  ;;  %v2351_v52 = vpack.c.bf16 %v1866_v51, %v1865_v50 }
 0x7c1   :  { %v1339_v60 = vmul.f32 1.442695, %v1336_v59 }
 0x7c2   :  { %v1352_v61 = vpop.permute.xlu1 %1351 }
 0x7c3   :  { %2399 = vpow2.f32 %v1339_v60  ;;  %2295 = vmatpush3.msra.mxu0 %v1352_v61 }
 0x7c4   :  { %2304 = vmatprep.subr.mxu0 %v2565_v14 }
 0x7c6   :  { %v1506_v5 = vpop.permute.xlu1 %1505 }
 0x7c9   :  { %v2398_v62 = vpop.eup %2397 }
 0x7ca   :  { %v1341_v63 = vsel %vm521_vm2, %v2398_v62, 0.0  ;;  %v1584_v9 = vpop.permute.xlu1 %1583 }
 0x7cb   :  { %1342 = vadd.xlane.f32.xlu0 %v1341_v63 }
 0x7cd   :  { %v2400_v36 = vpop.eup %2399 }
 0x7ce   :  { %v1344_v0 = vsel %vm521_vm2, %v2400_v36, 0.0  ;;  %v1582_v11 = vpop.permute.xlu1 %1581 }
 0x7cf   :  { %1345 = vadd.xlane.f32.xlu0 %v1344_v0 }
 0x7e5   :  { %1503 = vrot.lane.b32.xlu0 %v2764_v35, %s2574_s20 }
 0x858   :  { %v1343_v2 = vpop.xlane.xlu0 %1342 }
 0x859   :  { %2401 = vrcp.f32 %v1343_v2 }
 0x85c   :  { %v1346_v4 = vpop.xlane.xlu0 %1345 }
 0x85d   :  { %2403 = vrcp.f32 %v1346_v4 }
 0x860   :  { %v1504_v35 = vpop.permute.xlu0 %1503 }
 0x863   :  { %v2402_v6 = vpop.eup %2401 }
 0x864   :  { %v1349_v7 = vmul.f32 %v2402_v6, %v2398_v62 }
 0x866   :  { %2297 = vmatmul.mubr.msk.f32.vlgmr.msra.gmra.mrb[10].mxu0 %vm521_vm2, %v1349_v7 }
 0x867   :  { %v2404_v8 = vpop.eup %2403  ;;  %2305 = vmatpush3.xpose.msk.msra.mxu0 %vm521_vm2, %v1506_v5  ;;  %2306 = vmatprep.mubr.msk.f32.mxu0 %vm2568_vm1, %v2565_v14 }
 0x868   :  { %v1350_v10 = vmul.f32 %v2404_v8, %v2400_v36  ;;  %2314 = vmatprep.subr.mxu0 %v2565_v14  ;;  %v1871_v8 = vsub.s32 1, %v2692_v19 }
 0x86a   :  { %2302 = vmatmul.mubr.msk.f32.vlgmr.msra.gmra.mrb[14].mxu1 %vm521_vm2, %v1350_v10  ;;  %2307 = vmatmul.mubr.msk.f32.vlgmr.msra.gmra.mrb[12].mxu0 %vm521_vm2, %v1504_v35 }
 0x86b   :  { %2310 = vmatpush3.xpose.msk.msra.mxu1 %vm521_vm2, %v1584_v9  ;;  %2311 = vmatprep.mubr.msk.f32.mxu1 %vm2568_vm1, %v2565_v14  ;;  %v1872_v9 = vrot.slane %v2748_v25, %v1871_v8 }
 0x86c   :  { %2319 = vmatprep.subr.mxu1 %v2565_v14  ;;  %2316 = vmatprep.mubr.msk.f32.mxu0 %vm2568_vm1, %v2565_v14 }
 0x86e   :  { %2312 = vmatmul.mubr.msk.f32.vlgmr.msra.gmra.mrb[16].mxu1 %vm521_vm2, %v1582_v11 }
 0x86f   :  { %2321 = vmatprep.mubr.msk.f32.mxu1 %vm2568_vm1, %v2565_v14 }
 0x939   :  { %v1423_v15 = vpop.f32.mrb[10].mxu0 }
 0x93a   :  { %v2298_v16 = vpop.f32.mrb[11].mxu0 }
 0x93d   :  { %v1499_v17 = vpop.f32.mrb[14].mxu1  ;;  %v1577_v18 = vpop.f32.mrb[12].mxu0 }
 0x93e   :  { %v2303_v20 = vpop.f32.mrb[15].mxu1  ;;  %v2308_v21 = vpop.f32.mrb[13].mxu0  ;;  %v1659_v23 = vsel %vm521_vm2, %v1577_v18, -inf }
 0x93f   :  { %1660 = vmax.xlane.f32.xlu0 %v1659_v23 }
 0x941   :  { %v1655_v24 = vpop.f32.mrb[16].mxu1 }
 0x942   :  { %v2313_v26 = vpop.f32.mrb[17].mxu1  ;;  %v1662_v27 = vsel %vm521_vm2, %v1655_v24, -inf }
 0x943   :  { %1663 = vmax.xlane.f32.xlu1 %v1662_v27 }
 0x954   :  { %1681 = vrot.lane.b32.xlu1 %v2757_v31, %s2574_s20 }
 0x958   :  { %1835 = vrot.lane.b32.xlu1 %v2848_v44, %s2561_s25 }
 0x95c   :  { %1837 = vrot.lane.b32.xlu1 %v2850_v46, %s2561_s25  ;;  %s2576_s25 = smov 24  }
 0x960   :  { %1845 = vrot.lane.b32.xlu1 %v1499_v17, %s2575_s21 }
 0x9cc   :  { %v1661_v30 = vpop.xlane.xlu0 %1660 }
 0x9cd   :  { %v1665_v32 = vsub.f32 %v1577_v18, %v1661_v30 }
 0x9cf   :  { %v1667_v33 = vmul.f32 1.442695, %v1665_v32 }
 0x9d0   :  { %v1664_v34 = vpop.xlane.xlu1 %1663 }
 0x9d1   :  { %2405 = vpow2.f32 %v1667_v33  ;;  %v1666_v37 = vsub.f32 %v1655_v24, %v1664_v34 }
 0x9d3   :  { %v1669_v38 = vmul.f32 1.442695, %v1666_v37 }
 0x9d4   :  { %v1682_v39 = vpop.permute.xlu1 %1681 }
 0x9d5   :  { %2407 = vpow2.f32 %v1669_v38  ;;  %2315 = vmatpush3.msra.mxu0 %v1682_v39 }
 0x9d6   :  { %2352 = vmatprep.subr.bf16.mxu0 %v2351_v52 }
 0x9d8   :  { %v1836_v59 = vpop.permute.xlu1 %1835 }
 0x9d9   :  { %v1857_v62 = vsel %vm521_vm2, %v2812_v1, %v1836_v59 }
 0x9db   :  { %v2406_v40 = vpop.eup %2405 }
 0x9dc   :  { %v1671_v31 = vsel %vm521_vm2, %v2406_v40, 0.0  ;;  %v1838_v60 = vpop.permute.xlu1 %1837 }
 0x9dd   :  { %1672 = vadd.xlane.f32.xlu0 %v1671_v31  ;;  %v1858_v4 = vsel %vm521_vm2, %v2814_v3, %v1838_v60  ;;  %v1991_v31 = vsub.s32 3, %v2692_v19 }
 0x9df   :  { %v2408_v41 = vpop.eup %2407 }
 0x9e0   :  { %v1674_v42 = vsel %vm521_vm2, %v2408_v41, 0.0  ;;  %v1846_v63 = vpop.permute.xlu1 %1845 }
 0x9e1   :  { %1675 = vadd.xlane.f32.xlu0 %v1674_v42  ;;  %v1861_v5 = vsel %vm1859_vm4, %v1858_v4, %v1846_v63 }
 0x9f7   :  { %1757 = vrot.lane.b32.xlu0 %v2755_v29, %s2574_s20  ;;  %v1867_v29 = vld [vmem:[#allocation10 + $0x10] sm:$0xff] }
 0x9f8   :  { %v2355_v54 = vpack.c.bf16 %v1868_v53, %v1867_v29 }
 0x9fb   :  { %1843 = vrot.lane.b32.xlu0 %v1423_v15, %s2575_s21 }
 0xa6a   :  { %v1673_v43 = vpop.xlane.xlu0 %1672 }
 0xa6b   :  { %2409 = vrcp.f32 %v1673_v43  ;;  %v1992_v43 = vrot.slane %v2748_v25, %v1991_v31 }
 0xa6e   :  { %v1676_v44 = vpop.xlane.xlu0 %1675 }
 0xa6f   :  { %2411 = vrcp.f32 %v1676_v44 }
 0xa72   :  { %v1758_v45 = vpop.permute.xlu0 %1757 }
 0xa73   :  { %2320 = vmatpush3.msra.mxu1 %v1758_v45 }
 0xa75   :  { %v2410_v46 = vpop.eup %2409 }
 0xa76   :  { %v1679_v47 = vmul.f32 %v2410_v46, %v2406_v40  ;;  %v1844_v61 = vpop.permute.xlu0 %1843  ;;  %v1985_v40 = vsub.s32 2, %v2692_v19 }
 0xa77   :  { %v1860_v36 = vsel %vm1859_vm4, %v1857_v62, %v1844_v61 }
 0xa78   :  { %2317 = vmatmul.mubr.msk.f32.vlgmr.msra.gmra.mrb[14].mxu0 %vm521_vm2, %v1679_v47 }
 0xa79   :  { %v2412_v48 = vpop.eup %2411  ;;  %2354 = vmatpush3.bf16.msra.mxu0 %v2351_v52 }
 0xa7a   :  { %v1680_v49 = vmul.f32 %v2412_v48, %v2408_v41  ;;  %2356 = vmatprep.subr.bf16.mxu0 %v2355_v54  ;;  %v1986_v41 = vrot.slane %v2748_v25, %v1985_v40 }
 0xa7c   :  { %2322 = vmatmul.mubr.msk.f32.vlgmr.msra.gmra.mrb[18].mxu1 %vm521_vm2, %v1680_v49 }
 0xa7d   :  { %2358 = vmatpush3.bf16.msra.mxu0 %v2355_v54 }
 0xb4b   :  { %v1753_v55 = vpop.f32.mrb[14].mxu0 }
 0xb4c   :  { %1851 = vrot.lane.b32.xlu0 %v1753_v55, %s2576_s25  ;;  %v2318_v56 = vpop.f32.mrb[15].mxu0 }
 0xb4f   :  { %v1829_v57 = vpop.f32.mrb[18].mxu1 }
 0xb50   :  { %1853 = vrot.lane.b32.xlu1 %v1829_v57, %s2576_s25  ;;  %v2323_v58 = vpop.f32.mrb[19].mxu1 }
 0xbbe   :  { %v1852_v0 = vpop.permute.xlu0 %1851 }
 0xbbf   :  { %v1863_v2 = vsel %vm1862_vm3, %v1860_v36, %v1852_v0 }
 0xbc0   :  { %2332 = vmatprep.mubr.msk.f32.mxu0 %vm347_vm0, %v1863_v2 }
 0xbc2   :  { %v1854_v6 = vpop.permute.xlu1 %1853 }
 0xbc3   :  { %v1864_v7 = vsel %vm1862_vm3, %v1861_v5, %v1854_v6 }
 0xbc4   :  { %2333 = vmatmul.mubr.msk.f32.vlgmr.msra.gmra.mrb[16].mxu0 %vm347_vm0, %v1864_v7 }
 0xc97   :  { %v2334_v1 = vpop.f32.mrb[16].mxu0 }
 0xc98   :  { %v1951_v10 = vadd.f32 %v2334_v1, %v1872_v9  ;;  %v1945_v35 = vpop.f32.mrb[17].mxu0 }
 0xc99   :  { %v1946_v11 = vadd.f32 %v1945_v35, %v1872_v9 }
 0xc9a   :  { %v1955_v15 = vadd.f32 %v1951_v10, %v2732_v13 }
 0xc9b   :  { %v1954_v16 = vadd.f32 %v1946_v11, %v2730_v12 }
 0xc9c   :  { %v1959_v17 = vsel %vm347_vm0, %v1955_v15, 0.0 }
 0xc9d   :  { %1960 = vadd.xlane.f32.xlu1 %v1959_v17  ;;  %v1956_v3 = vsel %vm347_vm0, %v1954_v16, 0.0 }
 0xc9e   :  { %1957 = vadd.xlane.f32.xlu0 %v1956_v3 }
 0xd2a   :  { %v1961_v18 = vpop.xlane.xlu1 %1960 }
 0xd2b   :  { %v1964_v20 = vmul.f32 0.03125, %v1961_v18  ;;  %v1958_v21 = vpop.xlane.xlu0 %1957 }
 0xd2c   :  { %v1963_v23 = vmul.f32 0.03125, %v1958_v21 }
 0xd2d   :  { %v1966_v24 = vsub.f32 %v1955_v15, %v1964_v20 }
 0xd2e   :  { %v1965_v26 = vsub.f32 %v1954_v16, %v1963_v23 }
 0xd2f   :  { %v1968_v32 = vmul.f32 %v1966_v24, %v1966_v24 }
 0xd30   :  { %v1967_v27 = vmul.f32 %v1965_v26, %v1965_v26 }
 0xd31   :  { %v1972_v13 = vsel %vm347_vm0, %v1968_v32, 0.0 }
 0xd32   :  { %v1969_v30 = vsel %vm347_vm0, %v1967_v27, 0.0 }
 0xd33   :  { %1970 = vadd.xlane.f32.xlu0 %v1969_v30 }
 0xd37   :  { %1973 = vadd.xlane.f32.xlu0 %v1972_v13 }
 0xdc0   :  { %v1971_v12 = vpop.xlane.xlu0 %1970 }
 0xdc1   :  { %v1975_v33 = vmul.f32 0.03125, %v1971_v12 }
 0xdc3   :  { %v1977_v34 = vadd.f32 1e-05, %v1975_v33 }
 0xdc4   :  { %v1974_v37 = vpop.xlane.xlu0 %1973 }
 0xdc5   :  { %2413 = vrsqrt.f32 %v1977_v34  ;;  %v1976_v38 = vmul.f32 0.03125, %v1974_v37 }
 0xdc7   :  { %v1978_v39 = vadd.f32 1e-05, %v1976_v38 }
 0xdc9   :  { %2415 = vrsqrt.f32 %v1978_v39 }
 0xdcf   :  { %v2414_v42 = vpop.eup %2413 }
 0xdd0   :  { %v1981_v44 = vmul.f32 %v2414_v42, %v1965_v26 }
 0xdd2   :  { %v1987_v45 = vmul.f32 %v1986_v41, %v1981_v44 }
 0xdd3   :  { %v2416_v46 = vpop.eup %2415 }
 0xdd4   :  { %v1993_v47 = vadd.f32 %v1992_v43, %v1987_v45  ;;  %v1982_v48 = vmul.f32 %v2416_v46, %v1966_v24 }
 0xdd6   :  { %v1988_v49 = vmul.f32 %v1986_v41, %v1982_v48  ;;  %v1995_v50 = vcombine.high %v1993_v47, %v2565_v14  ;;  %v2002_v19 = vrot.slane %v1993_v47, %v2695_v22 }
 0xdd8   :  { %v1994_v51 = vadd.f32 %v1992_v43, %v1988_v49  ;;  %v2009_v53 = vrot.slane %v1995_v50, %v2695_v22 }
 0xdda   :  { %v2010_v52 = vcombine.high %v1994_v51, %v2565_v14  ;;  %v2017_v29 = vrot.slane %v1994_v51, %v2695_v22 }
 0xddc   :  { %v2024_v54 = vrot.slane %v2010_v52, %v2695_v22  ;;  %v2025_v25 = vcombine.low %v2002_v19, %v2017_v29  ;;  %v2026_v55 = vcombine.high %v2002_v19, %v2017_v29 }
 0xdde   :  { %v2033_v56 = vrot.slane %v2025_v25, %v2701_v28  ;;  %v2040_v57 = vrot.slane %v2026_v55, %v2701_v28  ;;  %v2041_v58 = vcombine.low %v2009_v53, %v2024_v54  ;;  %v2042_v59 = vcombine.high %v2009_v53, %v2024_v54 }
 0xde0   :  { %v2049_v60 = vrot.slane %v2041_v58, %v2701_v28  ;;  %v2056_v14 = vrot.slane %v2042_v59, %v2701_v28  ;;  %v2061_v61 = vcombine.low %v2033_v56, %v2040_v57  ;;  %v2170_v62 = vcombine.high %v2033_v56, %v2040_v57 }
 0xde2   :  { %v2068_v63 = vrot.slane %v2061_v61, %v2695_v22  ;;  %v2076_v36 = vrot.slane %v2170_v62, %v2695_v22  ;;  %v2077_v0 = vcombine.low %v2049_v60, %v2056_v14  ;;  %v2171_v2 = vcombine.high %v2049_v60, %v2056_v14 }
 0xde4   :  { %v2084_v4 = vrot.slane %v2077_v0, %v2695_v22  ;;  %v2092_v5 = vrot.slane %v2171_v2, %v2695_v22  ;;  %v2093_v6 = vcombine.low %v2068_v63, %v2076_v36 }
 0xde6   :  { %v2101_v7 = vcombine.low %v2084_v4, %v2092_v5  ;;  %v2100_v8 = vrot.slane %v2093_v6, %v2701_v28 }
 0xde8   :  { %v2108_v9 = vrot.slane %v2101_v7, %v2701_v28 }
 0xdea   :  { %v2110_v1 = vcombine.high %v2100_v8, %v2108_v9  ;;  %v2109_v10 = vcombine.low %v2100_v8, %v2108_v9 }
 0xdec   :  { %2112 = vrot.lane.b32.xlu1 %v2110_v1, %s2577_s22 }
 0xe5e   :  { %v2113_v35 = vpop.permute.xlu1 %2112 }
 0xe5f   :  { %v2115_v11 = vsel %vm347_vm0, %v2109_v10, %v2113_v35 }
 0xe60   :  { %2117 = vst.msk [vmem:[#allocation11] sm:$0xff] %vm2116_vm5, %v2115_v11 }
 0xe61   :  { %2538 = shalt.err (!%p2535_p2)
}
 0xe62   :  { %s2539_s27 = scalar_lea.hbm %s2952_s7, 128 }
 0xe63   :  { %p2540_p3 = scmp.ne.s32.totalorder %s2952_s7, %s2539_s27  ;;  %p2543_p4 = scmp.lt.u32.totalorder %s2539_s27, %s2952_s7 }
 0xe65   :  { %p2545_p5 = pnand %p2543_p4, %p2540_p3 }
 0xe67   :  { %2548 = shalt.err (!%p2545_p5)
}
 0xe68   :  { %2127 = dma.vmem_to_hbm [thread:$0]  %s2125_s1, 128, %s2952_s7, [#allocation4]  }
 0xe69   :  { %2555 = dma.done.wait [#allocation4], 128  }
 0xe6a   :  { %2556 = vsyncadd [#allocation4], 4294967168 }
 0xe6b   :  { %2131 = vsyncpa [#allocation3], 1 }
 0xe6c   :  { %2132 = vsyncpa [#allocation6], 1 }
 0xe6d   :  { %2133 = vsyncpa [#allocation9], 1 }
 0xe6e   :  { %2134 = vsyncpa [#allocation4], 1 }

</bundles_post_ra>
